<compile_context>
chip_gen: v7x
topology: tpu7x:2x2x1
jax: 0.10.0
libtpu: 0.0.40
codegen_flags: <defaults>
</compile_context>

<pallas_src>
import functools

import jax
import jax.numpy as jnp
import numpy as np
from jax.experimental import pallas as pl
from jax.experimental.pallas import tpu as pltpu


def _multiflow_kernel(xT_ref, w_ref, b_ref, cT_ref, csatT_ref, ii_ref, *,
                      threshold, num_channels):
    K = num_channels
    xT = xT_ref[...]                       # (K, TB)  channels x batch-tile
    w = w_ref[...]                         # (K, K)   PyTorch Linear weight
    b = b_ref[...]                         # (K, 1)

    # --- channel_kernel: C^T[i, b] = sum_j W[i, j] * x[b, j] + bias[i] ---
    # K rank-1 broadcast FMAs on the VPU; no MXU push/pop for a (B,4)x(4,4) dot.
    xj = xT[0:1, :]                        # (1, TB)
    acc = w[:, 0:1] * xj                   # (K, TB)
    sq = xj * xj                           # (1, TB), reused for the Gaussian -log_prob
    for j in range(1, K):
        xj = xT[j:j + 1, :]
        acc = acc + w[:, j:j + 1] * xj
        sq = sq + xj * xj
    C = acc + b                            # (K, TB)
    cT_ref[...] = C

    # --- saturate(C, threshold):
    #   1.0 if this channel saturated, C if NO other channel saturated, else 0.
    s = C > threshold                                              # (K, TB) bool
    n_sat = jnp.sum(s.astype(jnp.float32), axis=0, keepdims=True)  # (1, TB)
    # "no OTHER channel saturated": exact small-integer arithmetic in f32.
    only_others_clear = (n_sat - s.astype(jnp.float32)) == 0.0     # (K, TB)
    csatT_ref[...] = jnp.where(s, 1.0, jnp.where(only_others_clear, C, 0.0))

    # --- images_intensity: -log_prob(x) under the transformed distributions.
    # TODO(synk): FFJORDTransform (neural-ODE continuous flow) has no clean
    # Pallas equivalent; flows act as identity, so every row equals the base
    # MultivariateNormal(0, I) -log_prob.  Emit a single (1, TB) lane-dense row;
    # the wrapper broadcasts it to (K, B) (avoids Kx redundant vst/HBM traffic).
    log2pi = jnp.log(2.0 * jnp.pi).astype(jnp.float32)
    ii_ref[...] = 0.5 * sq + 0.5 * K * log2pi


@functools.partial(jax.jit, static_argnames=("threshold", "block_b"))
def multiflow_forward(x, weight, bias, *, threshold=0.9, block_b=8192):
    """x: (B, K) f32; weight: (K, K) PyTorch Linear weight; bias: (K,)."""
    B, K = x.shape
    LANE = 128
    block_b = max(LANE, (block_b // LANE) * LANE)        # keep tile lane-multiple
    tb = min(block_b, pl.cdiv(B, LANE) * LANE)           # batch tile (lanes)
    b_pad = pl.cdiv(B, tb) * tb
    grid = (b_pad // tb,)

    # Pad + transpose once under jit (fused with the dispatch); no eager weight.T.
    xT = jnp.pad(x.astype(jnp.float32), ((0, b_pad - B), (0, 0))).T   # (K, b_pad)
    bias_col = bias.astype(jnp.float32).reshape(K, 1)

    kernel = functools.partial(_multiflow_kernel, threshold=threshold,
                               num_channels=K)

    cT, csatT, ii_row = pl.pallas_call(
        kernel,
        grid=grid,
        in_specs=[
            pl.BlockSpec((K, tb), lambda i: (0, i)),   # x^T batch tile
            pl.BlockSpec((K, K), lambda i: (0, 0)),    # weight, resident
            pl.BlockSpec((K, 1), lambda i: (0, 0)),    # bias, resident
        ],
        out_specs=(
            pl.BlockSpec((K, tb), lambda i: (0, i)),   # C^T
            pl.BlockSpec((K, tb), lambda i: (0, i)),   # C_saturated^T
            pl.BlockSpec((1, tb), lambda i: (0, i)),   # -log_prob row
        ),
        out_shape=(
            jax.ShapeDtypeStruct((K, b_pad), jnp.float32),
            jax.ShapeDtypeStruct((K, b_pad), jnp.float32),
            jax.ShapeDtypeStruct((1, b_pad), jnp.float32),
        ),
        compiler_params=pltpu.CompilerParams(
            dimension_semantics=("parallel",)),
    )(xT, weight.astype(jnp.float32), bias_col)

    # Restore the PyTorch contract: C, C_saturated as (B, K); intensity as (K, B).
    C = cT[:, :B].T
    C_sat = csatT[:, :B].T
    images_intensity = jnp.broadcast_to(ii_row[:, :B], (K, B))
    return C, C_sat, images_intensity


def multiflow_reference(x, weight, bias, threshold=0.9):
    """Pure-JAX reference of the same (identity-flow) semantics."""
    B, K = x.shape
    C = x @ weight.T + bias
    s = (C > threshold).astype(jnp.float32)
    sb = 1.0 - s
    n_sat = jnp.sum(s, axis=-1, keepdims=True)
    p = ((n_sat - s) == 0.0).astype(jnp.float32)
    csat = sb * p * C + s
    neg_lp = 0.5 * jnp.sum(x * x, axis=-1) + 0.5 * K * jnp.log(2.0 * jnp.pi)
    ii = jnp.broadcast_to(neg_lp[None, :], (K, B))
    return C, csat, ii


if __name__ == "__main__":
    B = 8          # batch of samples
    K = 4          # channel_size = len(flow_family)

    key = jax.random.PRNGKey(0)
    kx, kw, kb = jax.random.split(key, 3)

    x = jax.random.normal(kx, (B, K), dtype=jnp.float32)
    # Deterministic synthetic Linear(K, K) parameters (no checkpoint load).
    weight = jax.random.uniform(kw, (K, K), dtype=jnp.float32,
                                minval=-1.0, maxval=1.0)
    bias = jax.random.uniform(kb, (K,), dtype=jnp.float32,
                              minval=-0.5, maxval=0.5)

    C, C_sat, images_intensity = multiflow_forward(x, weight, bias)
    jax.block_until_ready((C, C_sat, images_intensity))

    C_r, C_sat_r, ii_r = multiflow_reference(x, weight, bias)
    assert C.shape == (B, K) and C_sat.shape == (B, K)
    assert images_intensity.shape == (K, B)
    np.testing.assert_allclose(np.asarray(C), np.asarray(C_r), rtol=1e-5, atol=1e-5)
    np.testing.assert_allclose(np.asarray(C_sat), np.asarray(C_sat_r), rtol=1e-5, atol=1e-5)
    np.testing.assert_allclose(np.asarray(images_intensity), np.asarray(ii_r),
                               rtol=1e-5, atol=1e-5)

    print("KERNEL_OK")
</pallas_src>

<mosaic_0001>
module attributes {stable_mosaic.version = 11 : i64} {
  func.func @_multiflow_kernel(%arg0: i32, %arg1: memref<4x128xf32, #tpu.memory_space<vmem>>, %arg2: memref<4x4xf32, #tpu.memory_space<vmem>>, %arg3: memref<4x1xf32, #tpu.memory_space<vmem>>, %arg4: memref<4x128xf32, #tpu.memory_space<vmem>>, %arg5: memref<4x128xf32, #tpu.memory_space<vmem>>, %arg6: memref<1x128xf32, #tpu.memory_space<vmem>>) attributes {dimension_semantics = [#tpu.dimension_semantics<parallel>], iteration_bounds = array<i64: 1>, scalar_prefetch = 0 : i64, scratch_operands = 0 : i64, tpu.core_type = #tpu.core_type<tc>, window_params = [{transform_indices = @transform_0, window_bounds = array<i64: 4, 128>}, {pipeline_mode = #tpu.pipeline_mode<synchronous>, transform_indices = @transform_1, window_bounds = array<i64: 4, 4>}, {pipeline_mode = #tpu.pipeline_mode<synchronous>, transform_indices = @transform_2, window_bounds = array<i64: 4, 1>}, {transform_indices = @transform_3, window_bounds = array<i64: 4, 128>}, {transform_indices = @transform_4, window_bounds = array<i64: 4, 128>}, {transform_indices = @transform_5, window_bounds = array<i64: 1, 128>}]} {
    %c0 = arith.constant 0 : index
    %c0_0 = arith.constant 0 : index
    %0 = vector.load %arg1[%c0, %c0_0] : memref<4x128xf32, #tpu.memory_space<vmem>>, vector<4x128xf32>
    %c0_1 = arith.constant 0 : index
    %c0_2 = arith.constant 0 : index
    %1 = vector.load %arg2[%c0_1, %c0_2] : memref<4x4xf32, #tpu.memory_space<vmem>>, vector<4x4xf32>
    %c0_3 = arith.constant 0 : index
    %c0_4 = arith.constant 0 : index
    %2 = vector.load %arg3[%c0_3, %c0_4] : memref<4x1xf32, #tpu.memory_space<vmem>>, vector<4x1xf32>
    %3 = vector.extract_strided_slice %0 {offsets = [0, 0], sizes = [1, 128], strides = [1, 1]} : vector<4x128xf32> to vector<1x128xf32>
    %4 = vector.extract_strided_slice %1 {offsets = [0, 0], sizes = [4, 1], strides = [1, 1]} : vector<4x4xf32> to vector<4x1xf32>
    %5 = vector.broadcast %4 : vector<4x1xf32> to vector<4x128xf32>
    %6 = vector.broadcast %3 : vector<1x128xf32> to vector<4x128xf32>
    %7 = arith.mulf %5, %6 : vector<4x128xf32>
    %8 = arith.mulf %3, %3 : vector<1x128xf32>
    %9 = vector.extract_strided_slice %0 {offsets = [1, 0], sizes = [1, 128], strides = [1, 1]} : vector<4x128xf32> to vector<1x128xf32>
    %10 = vector.extract_strided_slice %1 {offsets = [0, 1], sizes = [4, 1], strides = [1, 1]} : vector<4x4xf32> to vector<4x1xf32>
    %11 = vector.broadcast %10 : vector<4x1xf32> to vector<4x128xf32>
    %12 = vector.broadcast %9 : vector<1x128xf32> to vector<4x128xf32>
    %13 = arith.mulf %11, %12 : vector<4x128xf32>
    %14 = arith.addf %7, %13 : vector<4x128xf32>
    %15 = arith.mulf %9, %9 : vector<1x128xf32>
    %16 = arith.addf %8, %15 : vector<1x128xf32>
    %17 = vector.extract_strided_slice %0 {offsets = [2, 0], sizes = [1, 128], strides = [1, 1]} : vector<4x128xf32> to vector<1x128xf32>
    %18 = vector.extract_strided_slice %1 {offsets = [0, 2], sizes = [4, 1], strides = [1, 1]} : vector<4x4xf32> to vector<4x1xf32>
    %19 = vector.broadcast %18 : vector<4x1xf32> to vector<4x128xf32>
    %20 = vector.broadcast %17 : vector<1x128xf32> to vector<4x128xf32>
    %21 = arith.mulf %19, %20 : vector<4x128xf32>
    %22 = arith.addf %14, %21 : vector<4x128xf32>
    %23 = arith.mulf %17, %17 : vector<1x128xf32>
    %24 = arith.addf %16, %23 : vector<1x128xf32>
    %25 = vector.extract_strided_slice %0 {offsets = [3, 0], sizes = [1, 128], strides = [1, 1]} : vector<4x128xf32> to vector<1x128xf32>
    %26 = vector.extract_strided_slice %1 {offsets = [0, 3], sizes = [4, 1], strides = [1, 1]} : vector<4x4xf32> to vector<4x1xf32>
    %27 = vector.broadcast %26 : vector<4x1xf32> to vector<4x128xf32>
    %28 = vector.broadcast %25 : vector<1x128xf32> to vector<4x128xf32>
    %29 = arith.mulf %27, %28 : vector<4x128xf32>
    %30 = arith.addf %22, %29 : vector<4x128xf32>
    %31 = arith.mulf %25, %25 : vector<1x128xf32>
    %32 = arith.addf %24, %31 : vector<1x128xf32>
    %33 = vector.broadcast %2 : vector<4x1xf32> to vector<4x128xf32>
    %34 = arith.addf %30, %33 : vector<4x128xf32>
    %c0_5 = arith.constant 0 : index
    %c0_6 = arith.constant 0 : index
    %35 = vector.load %arg4[%c0_5, %c0_6] : memref<4x128xf32, #tpu.memory_space<vmem>>, vector<4x128xf32>
    tpu.vector_store %arg4[%c0_5, %c0_6], %34 {strides = array<i32>} : memref<4x128xf32, #tpu.memory_space<vmem>>, vector<4x128xf32>,
    %cst = arith.constant 0.899999976 : f32
    %36 = vector.broadcast %cst : f32 to vector<4x128xf32>
    %37 = arith.cmpf ogt, %34, %36 : vector<4x128xf32>
    %38 = arith.extui %37 : vector<4x128xi1> to vector<4x128xi32>
    %39 = arith.sitofp %38 : vector<4x128xi32> to vector<4x128xf32>
    %cst_7 = arith.constant dense<0.000000e+00> : vector<128xf32>
    %40 = vector.multi_reduction <add>, %39, %cst_7 [0] : vector<4x128xf32> to vector<128xf32>
    %41 = vector.shape_cast %40 : vector<128xf32> to vector<1x128xf32>
    %42 = arith.extui %37 : vector<4x128xi1> to vector<4x128xi32>
    %43 = arith.sitofp %42 : vector<4x128xi32> to vector<4x128xf32>
    %44 = vector.broadcast %41 : vector<1x128xf32> to vector<4x128xf32>
    %45 = arith.subf %44, %43 : vector<4x128xf32>
    %cst_8 = arith.constant 0.000000e+00 : f32
    %46 = vector.broadcast %cst_8 : f32 to vector<4x128xf32>
    %47 = arith.cmpf oeq, %45, %46 : vector<4x128xf32>
    %cst_9 = arith.constant 0.000000e+00 : f32
    %48 = vector.broadcast %cst_9 : f32 to vector<4x128xf32>
    %49 = arith.select %47, %34, %48 : vector<4x128xi1>, vector<4x128xf32>
    %cst_10 = arith.constant 1.000000e+00 : f32
    %50 = vector.broadcast %cst_10 : f32 to vector<4x128xf32>
    %51 = arith.select %37, %50, %49 : vector<4x128xi1>, vector<4x128xf32>
    %c0_11 = arith.constant 0 : index
    %c0_12 = arith.constant 0 : index
    %52 = vector.load %arg5[%c0_11, %c0_12] : memref<4x128xf32, #tpu.memory_space<vmem>>, vector<4x128xf32>
    tpu.vector_store %arg5[%c0_11, %c0_12], %51 {strides = array<i32>} : memref<4x128xf32, #tpu.memory_space<vmem>>, vector<4x128xf32>,
    %cst_13 = arith.constant 6.28318548 : f32
    %53 = math.log %cst_13 : f32
    %cst_14 = arith.constant 5.000000e-01 : f32
    %54 = vector.broadcast %cst_14 : f32 to vector<1x128xf32>
    %55 = arith.mulf %54, %32 : vector<1x128xf32>
    %cst_15 = arith.constant 2.000000e+00 : f32
    %56 = arith.mulf %cst_15, %53 : f32
    %57 = vector.broadcast %56 : f32 to vector<1x128xf32>
    %58 = arith.addf %55, %57 : vector<1x128xf32>
    %c0_16 = arith.constant 0 : index
    %c0_17 = arith.constant 0 : index
    %59 = vector.load %arg6[%c0_16, %c0_17] : memref<1x128xf32, #tpu.memory_space<vmem>>, vector<1x128xf32>
    tpu.vector_store %arg6[%c0_16, %c0_17], %58 {strides = array<i32>} : memref<1x128xf32, #tpu.memory_space<vmem>>, vector<1x128xf32>,
    return
  }
  func.func @transform_0(%arg0: i32) -> (i32, i32) {
    %c0_i32 = arith.constant 0 : i32
    %c0_i32_0 = arith.constant 0 : i32
    return %c0_i32, %arg0 : i32, i32
  }
  func.func @transform_1(%arg0: i32) -> (i32, i32) {
    %c0_i32 = arith.constant 0 : i32
    %c0_i32_0 = arith.constant 0 : i32
    %c0_i32_1 = arith.constant 0 : i32
    return %c0_i32, %c0_i32_0 : i32, i32
  }
  func.func @transform_2(%arg0: i32) -> (i32, i32) {
    %c0_i32 = arith.constant 0 : i32
    %c0_i32_0 = arith.constant 0 : i32
    %c0_i32_1 = arith.constant 0 : i32
    return %c0_i32, %c0_i32_0 : i32, i32
  }
  func.func @transform_3(%arg0: i32) -> (i32, i32) {
    %c0_i32 = arith.constant 0 : i32
    %c0_i32_0 = arith.constant 0 : i32
    return %c0_i32, %arg0 : i32, i32
  }
  func.func @transform_4(%arg0: i32) -> (i32, i32) {
    %c0_i32 = arith.constant 0 : i32
    %c0_i32_0 = arith.constant 0 : i32
    return %c0_i32, %arg0 : i32, i32
  }
  func.func @transform_5(%arg0: i32) -> (i32, i32) {
    %c0_i32 = arith.constant 0 : i32
    %c0_i32_0 = arith.constant 0 : i32
    return %c0_i32, %arg0 : i32, i32
  }
}

</mosaic_0001>

<bundles_post_ra>
// kernel: multiflow_forward.1
= control target key start
LH: loop header
LB: loop body
LE: loop exit
PB: predicated region body
PF: predicated region fallthrough
CT: control target
= control target key end

     0   :  { %v121_v0 = vmov 0   ;;  %v122_v2 = vmov 2   ;;  %v123_v7 = vmov 1   ;;  %v124_v8 = vmov 3   ;;  %s174_s1 = inlined_call_operand.vmem [shape: f32[4,4], index: 1, kind: input, shape index: {}]   ;;  %s175_s0 = inlined_call_operand.vmem [shape: f32[4,128], index: 0, kind: input, shape index: {}]   ;;  %s176_s2 = inlined_call_operand.vmem [shape: f32[4,1], index: 2, kind: input, shape index: {}]   ;;  %s177_s5 = inlined_call_operand.vmem [shape: f32[1,128], index: 5, kind: output, shape index: {2}]   ;;  %s178_s3 = inlined_call_operand.vmem [shape: f32[4,128], index: 3, kind: output, shape index: {0}]   ;;  %s179_s4 = inlined_call_operand.vmem [shape: f32[4,128], index: 4, kind: output, shape index: {1}]  }
   0x1   :  { %115 = vset.pattern.permute.xlu0 %v121_v0  ;;  %v18_v1 = vld [vmem:[%s174_s1] sm:$0xf]  ;;  %117 = vset.pattern.permute.xlu1 %v122_v2  ;;  %v25_v16 = vlaneseq  ;;  %vm81_vm0 = vcmask 1043456   ;;  %v125_v39 = vmov 0.0  }
   0x2   :  { %v17_v3 = vld [vmem:[%s175_s0] sm:$0xf]  ;;  %22 = vperm.xlu0 %115, %v18_v1   ;;  %46 = vperm.xlu1 %117, %v18_v1  }
   0x3   :  { %v30_v4 = vmul.f32 %v17_v3, %v17_v3  ;;  %v19_v12 = vld [vmem:[%s176_s2] sm:$0xf]  ;;  %v26_v17 = vshrl.u32 %v25_v16, 7 }
   0x5   :  { %v42_v5 = vrot.slane %v30_v4, 1  ;;  %v55_v6 = vrot.slane %v30_v4, 2  ;;  %v68_v10 = vrot.slane %v30_v4, 3  ;;  %v27_v18 = vsub.s32 0, %v26_v17 }
   0x6   :  { %116 = vset.pattern.permute.xlu0 %v123_v7  ;;  %118 = vset.pattern.permute.xlu1 %v124_v8  ;;  %v37_v19 = vsub.s32 1, %v26_v17  ;;  %v51_v21 = vsub.s32 2, %v26_v17  ;;  %v64_v23 = vsub.s32 3, %v26_v17 }
   0x7   :  { %v44_v9 = vadd.f32 %v42_v5, %v30_v4  ;;  %32 = vperm.xlu0 %116, %v18_v1   ;;  %59 = vperm.xlu1 %118, %v18_v1   ;;  %v28_v24 = vrot.slane %v17_v3, %v27_v18 }
   0x8   :  { %v38_v25 = vrot.slane %v17_v3, %v37_v19  ;;  %v52_v26 = vrot.slane %v17_v3, %v51_v21  ;;  %v65_v27 = vrot.slane %v17_v3, %v64_v23 }
   0x9   :  { %v57_v11 = vadd.f32 %v55_v6, %v44_v9 }
   0xb   :  { %v70_v13 = vadd.f32 %v68_v10, %v57_v11  ;;  %119 = vset.pattern.permute.xlu1 %v121_v0  ;;  %120 = vset.pattern.permute.xlu0 %v121_v0 }
   0xc   :  { %73 = vperm.xlu1 %119, %v19_v12  }
   0xd   :  { %v94_v14 = vmul.f32 0.5, %v70_v13 }
   0xf   :  { %v95_v15 = vadd.f32 3.675754, %v94_v14 }
  0x11   :  { %96 = vst [vmem:[%s177_s5] sm:$0x1] %v95_v15 }
  0x81   :  { %v23_v20 = vpop.permute.xlu0 %22  ;;  %v47_v22 = vpop.permute.xlu1 %46 }
  0x82   :  { %v29_v30 = vmul.f32 %v28_v24, %v23_v20  ;;  %v53_v32 = vmul.f32 %v52_v26, %v47_v22 }
  0x86   :  { %v33_v28 = vpop.permute.xlu0 %32  ;;  %v60_v29 = vpop.permute.xlu1 %59 }
  0x87   :  { %v39_v31 = vmul.f32 %v38_v25, %v33_v28  ;;  %v66_v34 = vmul.f32 %v65_v27, %v60_v29 }
  0x89   :  { %v40_v33 = vadd.f32 %v39_v31, %v29_v30 }
  0x8b   :  { %v54_v35 = vadd.f32 %v53_v32, %v40_v33  ;;  %v74_v36 = vpop.permute.xlu1 %73 }
  0x8d   :  { %v67_v37 = vadd.f32 %v66_v34, %v54_v35 }
  0x8f   :  { %v76_v38 = vadd.f32 %v74_v36, %v67_v37 }
  0x91   :  { %77 = vst [vmem:[%s178_s3] sm:$0xf] %v76_v38  ;;  %vm78_vm1 = vcmp.gt.f32.partialorder %v76_v38, 0.9 }
  0x92   :  { %v109_v40 = vsel %vm78_vm1, 1.0, %v125_v39 }
  0x93   :  { %v82_v41 = vsel %vm81_vm0, %v109_v40, 0.0 }
  0x94   :  { %v83_v42 = vrot.slane %v82_v41, 4 }
  0x96   :  { %v84_v43 = vadd.f32 %v83_v42, %v82_v41 }
  0x98   :  { %v85_v44 = vrot.slane %v84_v43, 2 }
  0x9a   :  { %v86_v45 = vadd.f32 %v85_v44, %v84_v43 }
  0x9c   :  { %v87_v46 = vrot.slane %v86_v45, 1 }
  0x9e   :  { %v88_v47 = vadd.f32 %v87_v46, %v86_v45 }
  0xa0   :  { %v89_v48 = vsub.f32 %v88_v47, %v109_v40 }
  0xa2   :  { %vm90_vm2 = vcmp.eq.f32.partialorder %v89_v48, 0.0 }
  0xa3   :  { %v91_v49 = vsel %vm90_vm2, %v76_v38, 0.0 }
  0xa4   :  { %v92_v50 = vsel %vm78_vm1, 1.0, %v91_v49 }
  0xa5   :  { %93 = vst [vmem:[%s179_s4] sm:$0xf] %v92_v50 }

</bundles_post_ra>
